<compile_context>
chip_gen: v5e
topology: v5e:2x2
jax: 0.10.0
libtpu: 0.0.40
codegen_flags: <defaults>
</compile_context>

<pallas_src>
import functools

import jax
import jax.numpy as jnp
from jax.experimental import pallas as pl
from jax.experimental.pallas import tpu as pltpu

IN_DIM = 7      # [x, y, z, quat]
HIDDEN = 32
OUT_DIM = 24    # 8 vertices * 3 coords
TOTAL = IN_DIM + OUT_DIM  # 31

_LANE = 128
_MIN_SPLIT_ROWS = 256  # below this, one tile; per-grid-step overhead dominates


def _round_up(x, m):
    return (x + m - 1) // m * m


def _device_supports_bf16_eup():
    """bf16 EUP/VPU exists on v6e / v7x; not on v5e and older."""
    try:
        kind = jax.devices()[0].device_kind.lower()
    except Exception:
        return False
    return ("v6" in kind) or ("v7" in kind) or ("tpu7" in kind)


def _augment_kernel(x_ref, w1_ref, b1_ref, w2_ref, b2_ref, out_ref, *, bf16_tanh):
    """One (tm, 7) row tile -> one fused (tm, 31) [x | vertices] tile."""
    x = x_ref[...].astype(jnp.float32)                       # (tm, 7)
    # bf16 feeds to the MXU, f32 accumulation.
    h = jnp.dot(x.astype(jnp.bfloat16), w1_ref[...],
                preferred_element_type=jnp.float32)          # (tm, 32)
    h = h + b1_ref[...]                                      # bias add in f32
    if bf16_tanh:
        # v6e/v7x: bf16 EUP tanh; result goes straight to the second matmul.
        a = jnp.tanh(h.astype(jnp.bfloat16))
    else:
        # v5e (no bf16 EUP/VPU) or bit-matched mode: f32 tanh, cast for MXU.
        a = jnp.tanh(h).astype(jnp.bfloat16)
    v = jnp.dot(a, w2_ref[...], preferred_element_type=jnp.float32)
    v = v + b2_ref[...]                                      # (tm, 24)
    # Fused passthrough: one full-width store of [x | vertices] per tile.
    out_ref[...] = jnp.concatenate([x, v], axis=1).astype(out_ref.dtype)


def module_augment_forward(x, w1, b1, w2, b2, *, block_rows=8192,
                           bf16_tanh=None, out_dtype=None):
    """ModuleAugment.forward: returns cat((x, module(x)), dim=1) of shape (B, 31)."""
    B, F = x.shape
    assert F == IN_DIM, x.shape
    if bf16_tanh is None:
        bf16_tanh = _device_supports_bf16_eup()
    out_dtype = x.dtype if out_dtype is None else jnp.dtype(out_dtype)

    # Row-tile choice:
    #  * sublane rule: when tm < B it must be a multiple of 8,
    #  * amortize grid-step overhead with large tiles,
    #  * >= 2 grid steps for B > _MIN_SPLIT_ROWS so v7x uses both TensorCores.
    block_rows = max(8, _round_up(int(block_rows), 8))
    if B <= _MIN_SPLIT_ROWS:
        tm = B                                   # single full-batch tile
    else:
        tm = min(block_rows, _round_up(pl.cdiv(B, 2), 8))
    grid = (pl.cdiv(B, tm),)                     # partial last block handled by Pallas

    # Weights in bf16 (halves weight DMA bytes, native MXU dtype); biases f32.
    w1_bf = w1.astype(jnp.bfloat16)
    w2_bf = w2.astype(jnp.bfloat16)
    b1_f = b1.astype(jnp.float32).reshape(1, HIDDEN)
    b2_f = b2.astype(jnp.float32).reshape(1, OUT_DIM)

    cost = pl.CostEstimate(
        flops=2 * B * (IN_DIM * HIDDEN + HIDDEN * OUT_DIM),
        transcendentals=B * HIDDEN,
        bytes_accessed=(B * IN_DIM * jnp.dtype(x.dtype).itemsize   # x read
                        + B * TOTAL * out_dtype.itemsize           # fused out write
                        + w1_bf.size * 2 + w2_bf.size * 2
                        + b1_f.size * 4 + b2_f.size * 4),
    )

    # VMEM budget: the (tm, 7) input and (tm, 31) output f32 blocks both pad to
    # 128 lanes and are double-buffered; weights/biases are tiny and resident.
    tile_bytes = tm * _LANE * 4
    vmem_limit = int(min(max(4 * tile_bytes + (6 << 20), 32 << 20), 100 << 20))

    kernel = functools.partial(_augment_kernel, bf16_tanh=bool(bf16_tanh))

    return pl.pallas_call(
        kernel,
        out_shape=jax.ShapeDtypeStruct((B, TOTAL), out_dtype),
        grid=grid,
        in_specs=[
            pl.BlockSpec((tm, IN_DIM), lambda i: (i, 0)),
            pl.BlockSpec((IN_DIM, HIDDEN), lambda i: (0, 0)),   # resident
            pl.BlockSpec((1, HIDDEN), lambda i: (0, 0)),        # resident
            pl.BlockSpec((HIDDEN, OUT_DIM), lambda i: (0, 0)),  # resident
            pl.BlockSpec((1, OUT_DIM), lambda i: (0, 0)),       # resident
        ],
        out_specs=pl.BlockSpec((tm, TOTAL), lambda i: (i, 0)),
        compiler_params=pltpu.CompilerParams(
            dimension_semantics=("parallel",),   # shards tiles over both TCs on v7x
            vmem_limit_bytes=vmem_limit,
        ),
        cost_estimate=cost,
    )(x, w1_bf, b1_f, w2_bf, b2_f)


def _reference(x, w1, b1, w2, b2, *, bf16_dots=True, bf16_tanh=False):
    """Plain-JAX reference, optionally matching the kernel's bf16 casts."""
    if bf16_dots:
        h = jnp.dot(x.astype(jnp.bfloat16), w1.astype(jnp.bfloat16),
                    preferred_element_type=jnp.float32) + b1.reshape(1, -1)
        if bf16_tanh:
            a = jnp.tanh(h.astype(jnp.bfloat16))
        else:
            a = jnp.tanh(h).astype(jnp.bfloat16)
        v = jnp.dot(a, w2.astype(jnp.bfloat16),
                    preferred_element_type=jnp.float32) + b2.reshape(1, -1)
    else:
        v = jnp.tanh(x @ w1 + b1.reshape(1, -1)) @ w2 + b2.reshape(1, -1)
    return jnp.concatenate([x, v], axis=1)


if __name__ == "__main__":
    key = jax.random.PRNGKey(0)
    kx, k1, k2, k3, k4 = jax.random.split(key, 5)

    BATCH = 8
    x = jax.random.normal(kx, (BATCH, IN_DIM), dtype=jnp.float32)
    w1 = jax.random.normal(k1, (IN_DIM, HIDDEN), dtype=jnp.float32) * 0.1
    b1 = jax.random.normal(k2, (1, HIDDEN), dtype=jnp.float32) * 0.1
    w2 = jax.random.normal(k3, (HIDDEN, OUT_DIM), dtype=jnp.float32) * 0.1
    b2 = jax.random.normal(k4, (1, OUT_DIM), dtype=jnp.float32) * 0.1

    # 1) Small batch, single fused tile, f32 tanh -> tight bf16-matched check.
    out = jax.block_until_ready(
        module_augment_forward(x, w1, b1, w2, b2, bf16_tanh=False))
    assert out.shape == (BATCH, TOTAL), out.shape
    ref_matched = _reference(x, w1, b1, w2, b2, bf16_dots=True, bf16_tanh=False)
    ref_f32 = _reference(x, w1, b1, w2, b2, bf16_dots=False)
    assert jnp.allclose(out, ref_matched, atol=1e-4, rtol=1e-4), "mismatch (bf16-matched)"
    assert jnp.allclose(out, ref_f32, atol=5e-2, rtol=5e-2), "mismatch (f32 ref)"

    # 2) Default path (bf16 tanh auto-enabled on v6e/v7x, f32 on v5e): sanity
    #    check against full-f32 math with bf16-level tolerance.
    out_auto = jax.block_until_ready(module_augment_forward(x, w1, b1, w2, b2))
    assert out_auto.shape == (BATCH, TOTAL), out_auto.shape
    assert jnp.allclose(out_auto, ref_f32, atol=5e-2, rtol=5e-2), "mismatch (auto path)"

    # 3) Multi-tile path with a partial final block (B not a multiple of tm,
    #    no host-side padding): exercises the grid, resident weight blocks and
    #    the Pallas-handled boundary block.
    B2 = 300
    x2 = jax.random.normal(kx, (B2, IN_DIM), dtype=jnp.float32)
    out2 = jax.block_until_ready(
        module_augment_forward(x2, w1, b1, w2, b2, block_rows=64, bf16_tanh=False))
    assert out2.shape == (B2, TOTAL), out2.shape
    ref2 = _reference(x2, w1, b1, w2, b2, bf16_dots=True, bf16_tanh=False)
    assert jnp.allclose(out2, ref2, atol=1e-4, rtol=1e-4), "mismatch (tiled path)"

    # TODO(synk): compute_jacobian (cat(eye, module.compute_jacobian)) is not
    # part of forward() and depends on the inner module's jacobian; omitted.
    print("KERNEL_OK")
</pallas_src>

<mosaic_0001>
module attributes {stable_mosaic.version = 11 : i64} {
  func.func @_augment_kernel(%arg0: i32, %arg1: memref<8x7xf32, #tpu.memory_space<vmem>>, %arg2: memref<7x32xbf16, #tpu.memory_space<vmem>>, %arg3: memref<1x32xf32, #tpu.memory_space<vmem>>, %arg4: memref<32x24xbf16, #tpu.memory_space<vmem>>, %arg5: memref<1x24xf32, #tpu.memory_space<vmem>>, %arg6: memref<8x31xf32, #tpu.memory_space<vmem>>) attributes {dimension_semantics = [#tpu.dimension_semantics<parallel>], iteration_bounds = array<i64: 1>, scalar_prefetch = 0 : i64, scratch_operands = 0 : i64, tpu.core_type = #tpu.core_type<tc>, window_params = [{transform_indices = @transform_0, window_bounds = array<i64: 8, 7>}, {pipeline_mode = #tpu.pipeline_mode<synchronous>, transform_indices = @transform_1, window_bounds = array<i64: 7, 32>}, {pipeline_mode = #tpu.pipeline_mode<synchronous>, transform_indices = @transform_2, window_bounds = array<i64: 1, 32>}, {pipeline_mode = #tpu.pipeline_mode<synchronous>, transform_indices = @transform_3, window_bounds = array<i64: 32, 24>}, {pipeline_mode = #tpu.pipeline_mode<synchronous>, transform_indices = @transform_4, window_bounds = array<i64: 1, 24>}, {transform_indices = @transform_5, window_bounds = array<i64: 8, 31>}]} {
    %c0 = arith.constant 0 : index
    %c0_0 = arith.constant 0 : index
    %0 = vector.load %arg1[%c0, %c0_0] : memref<8x7xf32, #tpu.memory_space<vmem>>, vector<8x7xf32>
    %1 = arith.truncf %0 : vector<8x7xf32> to vector<8x7xbf16>
    %c0_1 = arith.constant 0 : index
    %c0_2 = arith.constant 0 : index
    %2 = vector.load %arg2[%c0_1, %c0_2] : memref<7x32xbf16, #tpu.memory_space<vmem>>, vector<7x32xbf16>
    %cst = arith.constant dense<0.000000e+00> : vector<8x32xf32>
    %3 = tpu.matmul %1, %2, %cst {dimension_numbers = #tpu.dot_dimension_numbers<[1], [0], [0], [1], [0, 0, 1, 1], [], []>} : vector<8x7xbf16>, vector<7x32xbf16>, vector<8x32xf32> -> vector<8x32xf32>
    %c0_3 = arith.constant 0 : index
    %c0_4 = arith.constant 0 : index
    %4 = vector.load %arg3[%c0_3, %c0_4] : memref<1x32xf32, #tpu.memory_space<vmem>>, vector<1x32xf32>
    %5 = vector.broadcast %4 : vector<1x32xf32> to vector<8x32xf32>
    %6 = arith.addf %3, %5 : vector<8x32xf32>
    %7 = math.tanh %6 : vector<8x32xf32>
    %8 = arith.truncf %7 : vector<8x32xf32> to vector<8x32xbf16>
    %c0_5 = arith.constant 0 : index
    %c0_6 = arith.constant 0 : index
    %9 = vector.load %arg4[%c0_5, %c0_6] : memref<32x24xbf16, #tpu.memory_space<vmem>>, vector<32x24xbf16>
    %cst_7 = arith.constant dense<0.000000e+00> : vector<8x24xf32>
    %10 = tpu.matmul %8, %9, %cst_7 {dimension_numbers = #tpu.dot_dimension_numbers<[1], [0], [0], [1], [0, 0, 1, 1], [], []>} : vector<8x32xbf16>, vector<32x24xbf16>, vector<8x24xf32> -> vector<8x24xf32>
    %c0_8 = arith.constant 0 : index
    %c0_9 = arith.constant 0 : index
    %11 = vector.load %arg5[%c0_8, %c0_9] : memref<1x24xf32, #tpu.memory_space<vmem>>, vector<1x24xf32>
    %12 = vector.broadcast %11 : vector<1x24xf32> to vector<8x24xf32>
    %13 = arith.addf %10, %12 : vector<8x24xf32>
    %14 = tpu.concatenate %0, %13 in 1 : vector<8x7xf32>, vector<8x24xf32> -> vector<8x31xf32>
    %c0_10 = arith.constant 0 : index
    %c0_11 = arith.constant 0 : index
    %15 = vector.load %arg6[%c0_10, %c0_11] : memref<8x31xf32, #tpu.memory_space<vmem>>, vector<8x31xf32>
    tpu.vector_store %arg6[%c0_10, %c0_11], %14 {strides = array<i32>} : memref<8x31xf32, #tpu.memory_space<vmem>>, vector<8x31xf32>,
    return
  }
  func.func @transform_0(%arg0: i32) -> (i32, i32) {
    %c0_i32 = arith.constant 0 : i32
    %c0_i32_0 = arith.constant 0 : i32
    return %arg0, %c0_i32 : i32, i32
  }
  func.func @transform_1(%arg0: i32) -> (i32, i32) {
    %c0_i32 = arith.constant 0 : i32
    %c0_i32_0 = arith.constant 0 : i32
    %c0_i32_1 = arith.constant 0 : i32
    return %c0_i32, %c0_i32_0 : i32, i32
  }
  func.func @transform_2(%arg0: i32) -> (i32, i32) {
    %c0_i32 = arith.constant 0 : i32
    %c0_i32_0 = arith.constant 0 : i32
    %c0_i32_1 = arith.constant 0 : i32
    return %c0_i32, %c0_i32_0 : i32, i32
  }
  func.func @transform_3(%arg0: i32) -> (i32, i32) {
    %c0_i32 = arith.constant 0 : i32
    %c0_i32_0 = arith.constant 0 : i32
    %c0_i32_1 = arith.constant 0 : i32
    return %c0_i32, %c0_i32_0 : i32, i32
  }
  func.func @transform_4(%arg0: i32) -> (i32, i32) {
    %c0_i32 = arith.constant 0 : i32
    %c0_i32_0 = arith.constant 0 : i32
    %c0_i32_1 = arith.constant 0 : i32
    return %c0_i32, %c0_i32_0 : i32, i32
  }
  func.func @transform_5(%arg0: i32) -> (i32, i32) {
    %c0_i32 = arith.constant 0 : i32
    %c0_i32_0 = arith.constant 0 : i32
    return %arg0, %c0_i32 : i32, i32
  }
}

</mosaic_0001>

<bundles_post_ra>
// kernel: tpu_custom_call.1
= control target key start
LH: loop header
LB: loop body
LE: loop exit
PB: predicated region body
PF: predicated region fallthrough
CT: control target
= control target key end

     0   :  { %vm33_vm0 = vcmask 1042432   ;;  %vm34_vm1 = vcmask 1043456   ;;  %v160_v1 = vmov 65535   ;;  %s216_s0 = inlined_call_operand.vmem [shape: f32[8,7], index: 0, kind: input, shape index: {}]   ;;  %s217_s1 = inlined_call_operand.vmem [shape: bf16[7,32], index: 1, kind: input, shape index: {}]   ;;  %s218_s2 = inlined_call_operand.vmem [shape: f32[1,32], index: 2, kind: input, shape index: {}]   ;;  %s219_s3 = inlined_call_operand.vmem [shape: bf16[32,24], index: 3, kind: input, shape index: {}]   ;;  %s220_s4 = inlined_call_operand.vmem [shape: f32[1,24], index: 4, kind: input, shape index: {}]   ;;  %s221_s5 = inlined_call_operand.hbm [shape: f32[8,31], index: 5, kind: output, shape index: {}]  }
   0x1   :  { %v24_v0 = vld [vmem:[%s217_s1] sm:$0xf]  ;;  %v35_v2 = vsel %vm33_vm0, 4294967295, %v160_v1 }
   0x2   :  { %v22_v3 = vld [vmem:[%s216_s0] sm:$0xff]  ;;  %v36_v4 = vsel %vm34_vm1, %v35_v2, 0 }
   0x3   :  { %10 = vsyncpa [#allocation3], 0  ;;  %v38_v5 = vand.u32 %v36_v4, %v24_v0  ;;  %v23_v6 = vpack.c.bf16 %v22_v3, %v22_v3  ;;  %vm29_vm2 = vcmask 56320   ;;  %v126_v7 = vld [vmem:[%s219_s3 + $0x8] sm:$0xff]  ;;  %v125_v8 = vld [vmem:[%s219_s3] sm:$0xff]  ;;  %vm75_vm3 = vcmask 261120  }
   0x4   :  { %85 = vmatpush.bf16.msra.mxu1 %v126_v7  ;;  %v130_v9 = vld [vmem:[%s218_s2] ss:$0 sm:$0xff]  ;;  %s161_s3 = smov 7   ;;  %s162_s28 = smov [#allocation2]   ;;  %vm97_vm4 = vcmask 252928  }
   0x5   :  { %47 = vmatpush.bf16.msra.mxu0 %v38_v5  ;;  %v131_v15 = vld [vmem:[%s220_s4] ss:$0 sm:$0xff]  ;;  %s104_s29 = sshll.u32 %s162_s28, 4  ;;  %s106_s6 = sshll.u32 %s221_s5, 4  ;;  %s105_s29 = int_to_ptr.vmem [resolvable:$true] %s104_s29  ;;  %s107_s6 = int_to_ptr.hbm [resolvable:$true] %s106_s6 }
   0x8   :  { %115 = vmatmul.msk.bf16.vlgmr.msra.gmra.mxu0 %vm29_vm2, %v23_v6  ;;  %86 = vmatpush.bf16.msra.mxu1 %v125_v8 }
  0x85   :  { %v49_v10 = vpop.f32.mrf.mxu0 }
  0x86   :  { %v50_v11 = vadd.f32 %v130_v9, %v49_v10 }
  0x88   :  { %132 = vtanh.f32 %v50_v11 }
  0x8d   :  { %v51_v12 = vpop.f32.mrf.mxu0 }
  0x8e   :  { %v133_v13 = vpop.eup %132 }
  0x8f   :  { %v54_v14 = vpack.c.bf16 %v133_v13, %v133_v13 }
  0x91   :  { %124 = vmatmul.msk.bf16.vlgmr.msra.gmra.mxu1 %vm75_vm3, %v54_v14 }
 0x10e   :  { %v88_v16 = vpop.f32.mrf.mxu1 }
 0x10f   :  { %v89_v17 = vadd.f32 %v131_v15, %v88_v16 }
 0x111   :  { %93 = vrot.lane.b32.xlu0 %v89_v17, %s161_s3 }
 0x116   :  { %v90_v18 = vpop.f32.mrf.mxu1 }
 0x183   :  { %v94_v19 = vpop.permute.xlu0 %93 }
 0x184   :  { %v96_v20 = vsel %vm29_vm2, %v22_v3, %v94_v19 }
 0x185   :  { %98 = vst.msk [vmem:[#allocation2] sm:$0xff] %vm97_vm4, %v96_v20 }
 0x186   :  { %109 = dma.vmem_to_hbm [thread:$0]  %s105_s29, 128, %s107_s6, [#allocation3]  }
 0x187   :  { %158 = dma.done.wait [#allocation3], 128  }
 0x188   :  { %159 = vsyncadd [#allocation3], 4294967168 }
 0x189   :  { %114 = vsyncpa [#allocation3], 1 }

</bundles_post_ra>
